<compile_context>
chip_gen: v7x
topology: tpu7x:2x2x1
jax: 0.10.0
libtpu: 0.0.40
codegen_flags: <defaults>
</compile_context>

<pallas_src>
import functools

import jax
import jax.numpy as jnp
from jax import lax
from jax.experimental import pallas as pl
from jax.experimental.pallas import tpu as pltpu

# Architecture constants from the PyTorch module.
D_ENC_DEMO = 8
D_ENC_HIST = 128
D_ENC = D_ENC_DEMO + D_ENC_HIST   # 136
D_H1 = 64
D_H2 = 16

# Bias slab lane offsets (128-aligned segment starts).
_B_ENC_OFF = 0      # [0:136]   = [bd | bh]
_B_H1_OFF = 256     # [256:320] = b1
_B_H2_OFF = 384     # [384:400] = b2
_B_OUT_OFF = 512    # [512:513] = b3
_B_WIDTH = 640


def _round_up(x, m):
    return (x + m - 1) // m * m


def _layout(demo_dim, hist_dim):
    """Row offsets of each weight inside the packed weight slab."""
    n_enc = demo_dim + hist_dim
    off_w1 = _round_up(n_enc, 16)            # bf16 packs 16 rows / sublane grp
    off_w2 = _round_up(off_w1 + D_ENC, 16)
    off_w3 = _round_up(off_w2 + D_H1, 16)
    n_rows = _round_up(off_w3 + 8, 16)
    return off_w1, off_w2, off_w3, n_rows


def _gelu_exact(x):
    # nn.GELU() default = exact erf formulation (kept in f32).
    return 0.5 * x * (1.0 + lax.erf(x * 0.7071067811865476))


def _softplus(x):
    # nn.Softplus default (beta=1), numerically stable.
    return jnp.logaddexp(x, 0.0)


def _intensity_kernel(demo_ref, hist_ref, w_ref, b_ref, out_ref, *,
                      demo_dim, hist_dim, off_w1, off_w2, off_w3):
    # Activations enter as f32, matmul operands are cast to bf16 (MXU-native);
    # all accumulation / elementwise math stays f32.
    demo = demo_ref[...].astype(jnp.bfloat16)            # [tb, demo_dim]
    hist = hist_ref[...].astype(jnp.bfloat16)            # [tb, hist_dim]

    # Static slices of the packed bf16 weight slab (free-ish, tiny copies).
    w_d = w_ref[0:demo_dim, :]                            # [demo_dim, 136]
    w_h = w_ref[demo_dim:demo_dim + hist_dim, :]          # [hist_dim, 136]
    w1 = w_ref[off_w1:off_w1 + D_ENC, 0:D_H1]             # [136, 64]
    w2 = w_ref[off_w2:off_w2 + D_H1, 0:D_H2]              # [64, 16]
    w3t = w_ref[off_w3:off_w3 + 8, 0:D_H2]                # [8, 16] (rows = w3.T)

    # Encoders as one block-diagonal matmul, split over the two inputs:
    # enc[:, 0:8] = demo_encoder pre-act, enc[:, 8:136] = history_encoder.
    enc = (jnp.dot(demo, w_d, preferred_element_type=jnp.float32)
           + jnp.dot(hist, w_h, preferred_element_type=jnp.float32)
           + b_ref[:, _B_ENC_OFF:_B_ENC_OFF + D_ENC])
    enc = _gelu_exact(enc)                                # [tb, 136] f32

    # intensity_net L1 on the (implicitly concatenated) encoder output.
    x = (jnp.dot(enc.astype(jnp.bfloat16), w1, preferred_element_type=jnp.float32)
         + b_ref[:, _B_H1_OFF:_B_H1_OFF + D_H1])
    x = _gelu_exact(x)                                    # [tb, 64]

    # intensity_net L2.
    x = (jnp.dot(x.astype(jnp.bfloat16), w2, preferred_element_type=jnp.float32)
         + b_ref[:, _B_H2_OFF:_B_H2_OFF + D_H2])
    x = _gelu_exact(x)                                    # [tb, 16]

    # intensity_net L3 (Linear(16,1) + Softplus), computed lane-dense:
    # yt[m, b] = sum_k w3t[m, k] * x[b, k]  ("A @ B.T" NT-dot) -> [8, tb].
    yt = lax.dot_general(
        w3t, x.astype(jnp.bfloat16),
        dimension_numbers=(((1,), (1,)), ((), ())),
        preferred_element_type=jnp.float32,
    )
    y = _softplus(yt[0:1, :] + b_ref[:, _B_OUT_OFF:_B_OUT_OFF + 1])  # [1, tb]
    out_ref[...] = y.astype(out_ref.dtype)


def pack_params(params):
    """One-time parameter prep: one bf16 weight slab + one f32 bias row."""
    wd, bd = params["wd"], params["bd"]   # [demo_dim, 8], [1, 8]
    wh, bh = params["wh"], params["bh"]   # [hist_dim, 128], [1, 128]
    w1, b1 = params["w1"], params["b1"]   # [136, 64], [1, 64]
    w2, b2 = params["w2"], params["b2"]   # [64, 16], [1, 16]
    w3, b3 = params["w3"], params["b3"]   # [16, 1], [1, 1]

    demo_dim, hist_dim = wd.shape[0], wh.shape[0]
    off_w1, off_w2, off_w3, n_rows = _layout(demo_dim, hist_dim)

    wslab = jnp.zeros((n_rows, D_ENC), jnp.float32)
    # Block-diagonal encoder weight.
    wslab = wslab.at[0:demo_dim, 0:D_ENC_DEMO].set(wd)
    wslab = wslab.at[demo_dim:demo_dim + hist_dim, D_ENC_DEMO:D_ENC].set(wh)
    wslab = wslab.at[off_w1:off_w1 + D_ENC, 0:D_H1].set(w1)
    wslab = wslab.at[off_w2:off_w2 + D_H1, 0:D_H2].set(w2)
    wslab = wslab.at[off_w3:off_w3 + 8, 0:D_H2].set(jnp.tile(w3.T, (8, 1)))
    wslab = wslab.astype(jnp.bfloat16)    # bf16 MXU operands

    bslab = jnp.zeros((1, _B_WIDTH), jnp.float32)
    bslab = bslab.at[:, 0:D_ENC_DEMO].set(bd)
    bslab = bslab.at[:, D_ENC_DEMO:D_ENC].set(bh)
    bslab = bslab.at[:, _B_H1_OFF:_B_H1_OFF + D_H1].set(b1)
    bslab = bslab.at[:, _B_H2_OFF:_B_H2_OFF + D_H2].set(b2)
    bslab = bslab.at[:, _B_OUT_OFF:_B_OUT_OFF + 1].set(b3)
    return wslab, bslab


@functools.partial(jax.jit, static_argnames=("tile_b",))
def intensity_net_forward(demo, hist, packed_params, *, tile_b=4096):
    B, demo_dim = demo.shape
    hist_dim = hist.shape[1]
    wslab, bslab = packed_params
    off_w1, off_w2, off_w3, n_rows = _layout(demo_dim, hist_dim)
    assert wslab.shape == (n_rows, D_ENC), wslab.shape
    assert bslab.shape == (1, _B_WIDTH), bslab.shape

    # Batch tile:
    #  * B <= 128: a single full-array block (no (8,128) divisibility needed).
    #  * otherwise: tb % 128 == 0 (lane-dense output row), capped so there are
    #    at least 2 grid steps when possible (both v7x TensorCores used), and
    #    at most tile_b rows (VMEM budget; keep <= 4096 on v7x's 64 MiB VMEM).
    if B <= 128:
        tb = B
    else:
        tb = max(128, min(_round_up(tile_b, 128), _round_up(pl.cdiv(B, 2), 128)))
    num_tiles = pl.cdiv(B, tb)   # ragged B: Pallas masks the partial last block

    kernel = functools.partial(
        _intensity_kernel, demo_dim=demo_dim, hist_dim=hist_dim,
        off_w1=off_w1, off_w2=off_w2, off_w3=off_w3)

    out = pl.pallas_call(
        kernel,
        grid=(num_tiles,),
        in_specs=[
            pl.BlockSpec((tb, demo_dim), lambda i: (i, 0)),
            pl.BlockSpec((tb, hist_dim), lambda i: (i, 0)),
            pl.BlockSpec(wslab.shape, lambda i: (0, 0)),   # VMEM-resident
            pl.BlockSpec(bslab.shape, lambda i: (0, 0)),   # VMEM-resident
        ],
        out_specs=pl.BlockSpec((1, tb), lambda i: (0, i)),  # lane-dense row
        out_shape=jax.ShapeDtypeStruct((1, B), jnp.float32),
        compiler_params=pltpu.CompilerParams(
            dimension_semantics=("parallel",),
            vmem_limit_bytes=48 * 1024 * 1024,
        ),
    )(demo, hist, wslab, bslab)

    return out.reshape(B, 1)


def init_params(key, demo_dim, history_dim):
    keys = jax.random.split(key, 10)

    def lin(kw, kb, fan_in, fan_out):
        scale = 1.0 / jnp.sqrt(fan_in)
        w = jax.random.uniform(kw, (fan_in, fan_out), jnp.float32, -scale, scale)
        b = jax.random.uniform(kb, (1, fan_out), jnp.float32, -scale, scale)
        return w, b

    wd, bd = lin(keys[0], keys[1], demo_dim, D_ENC_DEMO)
    wh, bh = lin(keys[2], keys[3], history_dim, D_ENC_HIST)
    w1, b1 = lin(keys[4], keys[5], D_ENC, D_H1)
    w2, b2 = lin(keys[6], keys[7], D_H1, D_H2)
    w3, b3 = lin(keys[8], keys[9], D_H2, 1)
    return dict(wd=wd, bd=bd, wh=wh, bh=bh, w1=w1, b1=b1, w2=w2, b2=b2,
                w3=w3, b3=b3)


def reference_forward(demo, hist, params):
    """Pure-JAX f32 reference of the PyTorch forward (eval mode)."""
    g = _gelu_exact
    d = g(demo @ params["wd"] + params["bd"])
    h = g(hist @ params["wh"] + params["bh"])
    c = jnp.concatenate([d, h], axis=1)
    x = g(c @ params["w1"] + params["b1"])
    x = g(x @ params["w2"] + params["b2"])
    return jnp.logaddexp(x @ params["w3"] + params["b3"], 0.0)


if __name__ == "__main__":
    demo_dim, history_dim = 16, 32

    key = jax.random.PRNGKey(0)
    params = init_params(jax.random.fold_in(key, 1), demo_dim, history_dim)
    packed = pack_params(params)

    # Case 1: tiny batch (single full-array tile).
    # Case 2: ragged multi-tile batch (2 grid steps, masked partial last block).
    for batch in (8, 300):
        kd, kh = jax.random.split(jax.random.fold_in(key, batch))
        demo = jax.random.normal(kd, (batch, demo_dim), jnp.float32)
        hist = jax.random.normal(kh, (batch, history_dim), jnp.float32)

        out = jax.block_until_ready(intensity_net_forward(demo, hist, packed))
        ref = reference_forward(demo, hist, params)

        assert out.shape == (batch, 1), out.shape
        # bf16 MXU operands (f32 accumulate) -> relaxed parity vs f32 reference.
        assert jnp.allclose(out, ref, atol=5e-2, rtol=5e-2), (
            float(jnp.max(jnp.abs(out - ref))))

    print("KERNEL_OK")
</pallas_src>

<mosaic_0001>
module attributes {stable_mosaic.version = 11 : i64} {
  func.func @_intensity_kernel(%arg0: i32, %arg1: memref<8x16xf32, #tpu.memory_space<vmem>>, %arg2: memref<8x32xf32, #tpu.memory_space<vmem>>, %arg3: memref<272x136xbf16, #tpu.memory_space<vmem>>, %arg4: memref<1x640xf32, #tpu.memory_space<vmem>>, %arg5: memref<1x8xf32, #tpu.memory_space<vmem>>) attributes {dimension_semantics = [#tpu.dimension_semantics<parallel>], iteration_bounds = array<i64: 1>, scalar_prefetch = 0 : i64, scratch_operands = 0 : i64, tpu.core_type = #tpu.core_type<tc>, window_params = [{transform_indices = @transform_0, window_bounds = array<i64: 8, 16>}, {transform_indices = @transform_1, window_bounds = array<i64: 8, 32>}, {pipeline_mode = #tpu.pipeline_mode<synchronous>, transform_indices = @transform_2, window_bounds = array<i64: 272, 136>}, {pipeline_mode = #tpu.pipeline_mode<synchronous>, transform_indices = @transform_3, window_bounds = array<i64: 1, 640>}, {transform_indices = @transform_4, window_bounds = array<i64: 1, 8>}]} {
    %c0 = arith.constant 0 : index
    %c0_0 = arith.constant 0 : index
    %0 = vector.load %arg1[%c0, %c0_0] : memref<8x16xf32, #tpu.memory_space<vmem>>, vector<8x16xf32>
    %1 = arith.truncf %0 : vector<8x16xf32> to vector<8x16xbf16>
    %c0_1 = arith.constant 0 : index
    %c0_2 = arith.constant 0 : index
    %2 = vector.load %arg2[%c0_1, %c0_2] : memref<8x32xf32, #tpu.memory_space<vmem>>, vector<8x32xf32>
    %3 = arith.truncf %2 : vector<8x32xf32> to vector<8x32xbf16>
    %c0_3 = arith.constant 0 : index
    %c0_4 = arith.constant 0 : index
    %4 = vector.load %arg3[%c0_3, %c0_4] : memref<272x136xbf16, #tpu.memory_space<vmem>>, vector<16x136xbf16>
    %c16 = arith.constant 16 : index
    %c0_5 = arith.constant 0 : index
    %5 = vector.load %arg3[%c16, %c0_5] : memref<272x136xbf16, #tpu.memory_space<vmem>>, vector<32x136xbf16>
    %c48 = arith.constant 48 : index
    %c0_6 = arith.constant 0 : index
    %6 = vector.load %arg3[%c48, %c0_6] : memref<272x136xbf16, #tpu.memory_space<vmem>>, vector<136x64xbf16>
    %c192 = arith.constant 192 : index
    %c0_7 = arith.constant 0 : index
    %7 = vector.load %arg3[%c192, %c0_7] : memref<272x136xbf16, #tpu.memory_space<vmem>>, vector<64x16xbf16>
    %c256 = arith.constant 256 : index
    %c0_8 = arith.constant 0 : index
    %8 = vector.load %arg3[%c256, %c0_8] : memref<272x136xbf16, #tpu.memory_space<vmem>>, vector<8x16xbf16>
    %cst = arith.constant dense<0.000000e+00> : vector<8x136xf32>
    %9 = tpu.matmul %1, %4, %cst {dimension_numbers = #tpu.dot_dimension_numbers<[1], [0], [0], [1], [0, 0, 1, 1], [], []>} : vector<8x16xbf16>, vector<16x136xbf16>, vector<8x136xf32> -> vector<8x136xf32>
    %cst_9 = arith.constant dense<0.000000e+00> : vector<8x136xf32>
    %10 = tpu.matmul %3, %5, %cst_9 {dimension_numbers = #tpu.dot_dimension_numbers<[1], [0], [0], [1], [0, 0, 1, 1], [], []>} : vector<8x32xbf16>, vector<32x136xbf16>, vector<8x136xf32> -> vector<8x136xf32>
    %11 = arith.addf %9, %10 : vector<8x136xf32>
    %c0_10 = arith.constant 0 : index
    %c0_11 = arith.constant 0 : index
    %12 = vector.load %arg4[%c0_10, %c0_11] : memref<1x640xf32, #tpu.memory_space<vmem>>, vector<1x136xf32>
    %13 = vector.broadcast %12 : vector<1x136xf32> to vector<8x136xf32>
    %14 = arith.addf %11, %13 : vector<8x136xf32>
    %cst_12 = arith.constant 5.000000e-01 : f32
    %15 = vector.broadcast %cst_12 : f32 to vector<8x136xf32>
    %16 = arith.mulf %15, %14 : vector<8x136xf32>
    %cst_13 = arith.constant 0.707106769 : f32
    %17 = vector.broadcast %cst_13 : f32 to vector<8x136xf32>
    %18 = arith.mulf %14, %17 : vector<8x136xf32>
    %19 = math.erf %18 : vector<8x136xf32>
    %cst_14 = arith.constant 1.000000e+00 : f32
    %20 = vector.broadcast %cst_14 : f32 to vector<8x136xf32>
    %21 = arith.addf %20, %19 : vector<8x136xf32>
    %22 = arith.mulf %16, %21 : vector<8x136xf32>
    %23 = arith.truncf %22 : vector<8x136xf32> to vector<8x136xbf16>
    %cst_15 = arith.constant dense<0.000000e+00> : vector<8x64xf32>
    %24 = tpu.matmul %23, %6, %cst_15 {dimension_numbers = #tpu.dot_dimension_numbers<[1], [0], [0], [1], [0, 0, 1, 1], [], []>} : vector<8x136xbf16>, vector<136x64xbf16>, vector<8x64xf32> -> vector<8x64xf32>
    %c0_16 = arith.constant 0 : index
    %c256_17 = arith.constant 256 : index
    %25 = vector.load %arg4[%c0_16, %c256_17] : memref<1x640xf32, #tpu.memory_space<vmem>>, vector<1x64xf32>
    %26 = vector.broadcast %25 : vector<1x64xf32> to vector<8x64xf32>
    %27 = arith.addf %24, %26 : vector<8x64xf32>
    %cst_18 = arith.constant 5.000000e-01 : f32
    %28 = vector.broadcast %cst_18 : f32 to vector<8x64xf32>
    %29 = arith.mulf %28, %27 : vector<8x64xf32>
    %cst_19 = arith.constant 0.707106769 : f32
    %30 = vector.broadcast %cst_19 : f32 to vector<8x64xf32>
    %31 = arith.mulf %27, %30 : vector<8x64xf32>
    %32 = math.erf %31 : vector<8x64xf32>
    %cst_20 = arith.constant 1.000000e+00 : f32
    %33 = vector.broadcast %cst_20 : f32 to vector<8x64xf32>
    %34 = arith.addf %33, %32 : vector<8x64xf32>
    %35 = arith.mulf %29, %34 : vector<8x64xf32>
    %36 = arith.truncf %35 : vector<8x64xf32> to vector<8x64xbf16>
    %cst_21 = arith.constant dense<0.000000e+00> : vector<8x16xf32>
    %37 = tpu.matmul %36, %7, %cst_21 {dimension_numbers = #tpu.dot_dimension_numbers<[1], [0], [0], [1], [0, 0, 1, 1], [], []>} : vector<8x64xbf16>, vector<64x16xbf16>, vector<8x16xf32> -> vector<8x16xf32>
    %c0_22 = arith.constant 0 : index
    %c384 = arith.constant 384 : index
    %38 = vector.load %arg4[%c0_22, %c384] : memref<1x640xf32, #tpu.memory_space<vmem>>, vector<1x16xf32>
    %39 = vector.broadcast %38 : vector<1x16xf32> to vector<8x16xf32>
    %40 = arith.addf %37, %39 : vector<8x16xf32>
    %cst_23 = arith.constant 5.000000e-01 : f32
    %41 = vector.broadcast %cst_23 : f32 to vector<8x16xf32>
    %42 = arith.mulf %41, %40 : vector<8x16xf32>
    %cst_24 = arith.constant 0.707106769 : f32
    %43 = vector.broadcast %cst_24 : f32 to vector<8x16xf32>
    %44 = arith.mulf %40, %43 : vector<8x16xf32>
    %45 = math.erf %44 : vector<8x16xf32>
    %cst_25 = arith.constant 1.000000e+00 : f32
    %46 = vector.broadcast %cst_25 : f32 to vector<8x16xf32>
    %47 = arith.addf %46, %45 : vector<8x16xf32>
    %48 = arith.mulf %42, %47 : vector<8x16xf32>
    %49 = arith.truncf %48 : vector<8x16xf32> to vector<8x16xbf16>
    %cst_26 = arith.constant dense<0.000000e+00> : vector<8x8xf32>
    %50 = tpu.matmul %8, %49, %cst_26 {dimension_numbers = #tpu.dot_dimension_numbers<[1], [1], [0], [0], [0, 0, 1, 0], [], []>} : vector<8x16xbf16>, vector<8x16xbf16>, vector<8x8xf32> -> vector<8x8xf32>
    %51 = vector.extract_strided_slice %50 {offsets = [0, 0], sizes = [1, 8], strides = [1, 1]} : vector<8x8xf32> to vector<1x8xf32>
    %c0_27 = arith.constant 0 : index
    %c512 = arith.constant 512 : index
    %52 = vector.load %arg4[%c0_27, %c512] : memref<1x640xf32, #tpu.memory_space<vmem>>, vector<1x1xf32>
    %53 = vector.broadcast %52 : vector<1x1xf32> to vector<1x8xf32>
    %54 = arith.addf %51, %53 : vector<1x8xf32>
    %cst_28 = arith.constant 0.000000e+00 : f32
    %55 = vector.broadcast %cst_28 : f32 to vector<1x8xf32>
    %56 = arith.maximumf %54, %55 : vector<1x8xf32>
    %57 = vector.broadcast %cst_28 : f32 to vector<1x8xf32>
    %58 = arith.subf %54, %57 : vector<1x8xf32>
    %59 = arith.cmpf one, %58, %58 : vector<1x8xf32>
    %60 = vector.broadcast %cst_28 : f32 to vector<1x8xf32>
    %61 = arith.addf %54, %60 : vector<1x8xf32>
    %62 = math.absf %58 : vector<1x8xf32>
    %cst_29 = arith.constant 0.000000e+00 : f32
    %63 = vector.broadcast %cst_29 : f32 to vector<1x8xf32>
    %64 = arith.subf %63, %62 : vector<1x8xf32>
    %65 = math.exp %64 : vector<1x8xf32>
    %66 = math.log1p %65 : vector<1x8xf32>
    %67 = arith.addf %56, %66 : vector<1x8xf32>
    %68 = arith.select %59, %61, %67 : vector<1x8xi1>, vector<1x8xf32>
    %c0_30 = arith.constant 0 : index
    %c0_31 = arith.constant 0 : index
    %69 = vector.load %arg5[%c0_30, %c0_31] : memref<1x8xf32, #tpu.memory_space<vmem>>, vector<1x8xf32>
    tpu.vector_store %arg5[%c0_30, %c0_31], %68 {strides = array<i32>} : memref<1x8xf32, #tpu.memory_space<vmem>>, vector<1x8xf32>,
    return
  }
  func.func @transform_0(%arg0: i32) -> (i32, i32) {
    %c0_i32 = arith.constant 0 : i32
    %c0_i32_0 = arith.constant 0 : i32
    return %arg0, %c0_i32 : i32, i32
  }
  func.func @transform_1(%arg0: i32) -> (i32, i32) {
    %c0_i32 = arith.constant 0 : i32
    %c0_i32_0 = arith.constant 0 : i32
    return %arg0, %c0_i32 : i32, i32
  }
  func.func @transform_2(%arg0: i32) -> (i32, i32) {
    %c0_i32 = arith.constant 0 : i32
    %c0_i32_0 = arith.constant 0 : i32
    %c0_i32_1 = arith.constant 0 : i32
    return %c0_i32, %c0_i32_0 : i32, i32
  }
  func.func @transform_3(%arg0: i32) -> (i32, i32) {
    %c0_i32 = arith.constant 0 : i32
    %c0_i32_0 = arith.constant 0 : i32
    %c0_i32_1 = arith.constant 0 : i32
    return %c0_i32, %c0_i32_0 : i32, i32
  }
  func.func @transform_4(%arg0: i32) -> (i32, i32) {
    %c0_i32 = arith.constant 0 : i32
    %c0_i32_0 = arith.constant 0 : i32
    return %c0_i32, %arg0 : i32, i32
  }
}

</mosaic_0001>

<bundles_post_ra>
// kernel: intensity_net_forward.1
= control target key start
LH: loop header
LB: loop body
LE: loop exit
PB: predicated region body
PF: predicated region fallthrough
CT: control target
= control target key end

     0   :  { %v599_v2 = vmov 0   ;;  %vm130_vm0 = vcmask 130048   ;;  %vm75_vm1 = vcmask 261120   ;;  %s731_s0 = inlined_call_operand.vmem [shape: f32[8,16], index: 0, kind: input, shape index: {}]   ;;  %s732_s1 = inlined_call_operand.vmem [shape: f32[8,32], index: 1, kind: input, shape index: {}]   ;;  %s733_s2 = inlined_call_operand.vmem [shape: bf16[272,136], index: 2, kind: input, shape index: {}]   ;;  %s734_s3 = inlined_call_operand.vmem [shape: f32[1,640], index: 3, kind: input, shape index: {}]   ;;  %s735_s4 = inlined_call_operand.hbm [shape: f32[1,8], index: 4, kind: output, shape index: {}]  }
   0x1   :  { %v541_v0 = vld [vmem:[%s733_s2 + $0x14] ss:$8 sps:$4 sm:$0xff]   ;;  %v543_v1 = vld [vmem:[%s733_s2 + $0x10] ss:$8 sps:$4 sm:$0xff]   ;;  %166 = vmatprep.mubr.bf16.mxu1 %v599_v2  ;;  %111 = vmatprep.mubr.bf16.mxu0 %v599_v2  ;;  %v544_v3 = vld [vmem:[%s733_s2 + $0x4] ss:$8 sps:$4 sm:$0xff]  }
   0x2   :  { %79 = vmatprep.subr.bf16.mxu0 %v541_v0  ;;  %v546_v4 = vld [vmem:[%s733_s2] ss:$8 sps:$4 sm:$0xff]   ;;  %540 = vset.pattern.permute.xlu0 %v599_v2  ;;  %v547_v5 = vld [vmem:[%s733_s2 + $0x24] ss:$8 sps:$4 sm:$0xff]   ;;  %v550_v10 = vld [vmem:[%s733_s2 + $0x30] ss:$8 sps:$4 sm:$0xff]  }
   0x3   :  { %80 = vmatpush1.bf16.msra.mxu0 %v543_v1  ;;  %v549_v6 = vld [vmem:[%s733_s2 + $0x20] ss:$8 sps:$4 sm:$0xff]   ;;  %134 = vmatprep.subr.bf16.mxu1 %v544_v3 }
   0x4   :  { %v19_v7 = vld [vmem:[%s731_s0] sm:$0xff]  ;;  %135 = vmatpush1.bf16.msra.mxu1 %v546_v4  ;;  %81 = vmatprep.subr.bf16.mxu0 %v547_v5 }
   0x5   :  { %v21_v8 = vld [vmem:[%s732_s1] sm:$0xff]  ;;  %v20_v9 = vpack.c.bf16 %v19_v7, %v19_v7  ;;  %267 = vmatprep.subr.bf16.mxu1 %v599_v2 }
   0x6   :  { %v22_v11 = vpack.c.bf16 %v21_v8, %v21_v8  ;;  %v551_v12 = vld [vmem:[%s733_s2 + $0x40] ss:$8 sps:$4 sm:$0xff]  }
   0x7   :  { %82 = vmatpush1.bf16.msra.mxu0 %v549_v6  ;;  %492 = vmatmul.mubr.msk.bf16.vlgmr.msra.gmra.mrb[0].mxu1 %vm130_vm0, %v20_v9 }
   0x8   :  { %268 = vmatpush1.bf16.msra.mxu1 %v550_v10 }
   0x9   :  { %269 = vmatprep.subr.bf16.mxu1 %v599_v2 }
   0xa   :  { %489 = vmatmul.mubr.msk.bf16.vlgmr.msra.gmra.mrb[0].mxu0 %vm75_vm1, %v22_v11 }
   0xc   :  { %270 = vmatpush1.bf16.msra.mxu1 %v551_v12 }
   0xd   :  { %9 = vsyncpa [#allocation3], 0  ;;  %271 = vmatprep.subr.bf16.mxu1 %v599_v2  ;;  %v552_v13 = vld [vmem:[%s733_s2 + $0x50] ss:$8 sps:$4 sm:$0xff]   ;;  %v553_v14 = vld [vmem:[%s733_s2 + $0x60] ss:$8 sps:$4 sm:$0xff]   ;;  %v177_v21 = vlaneseq }
   0xe   :  { %v554_v15 = vld [vmem:[%s733_s2 + $0x70] ss:$8 sps:$4 sm:$0xff]   ;;  %v555_v16 = vld [vmem:[%s733_s2 + $0x80] ss:$8 sps:$4 sm:$0xff]   ;;  %vm263_vm2 = vcmask 1043456   ;;  %vm259_vm3 = vcmask 64512  }
   0xf   :  { %v556_v17 = vld [vmem:[%s733_s2 + $0x90] ss:$8 sps:$4 sm:$0xff]   ;;  %v557_v18 = vld [vmem:[%s733_s2 + $0xa0] ss:$8 sps:$4 sm:$0xff]   ;;  %v680_v22 = vshrl.u32 %v177_v21, 7  ;;  %v600_v53 = vmov 0.0  }
  0x10   :  { %272 = vmatpush1.bf16.msra.mxu1 %v552_v13  ;;  %v558_v19 = vld [vmem:[%s733_s2 + $0xb0] ss:$0 sps:$4 sm:$0xff]   ;;  %v175_v24 = vld [vmem:[%s734_s3] sm:$0x3]  ;;  %518 = vmatprep.subr.bf16.mxu0 %v600_v53  ;;  %vm601_vm4 = vmmov 0   ;;  %vm344_vm5 = vcmask 523264  }
  0x11   :  { %273 = vmatprep.subr.bf16.mxu1 %v599_v2  ;;  %v265_v20 = vsel %vm263_vm2, %v558_v19, 0  ;;  %v179_v23 = vsub.s32 0, %v680_v22  ;;  %v183_v25 = vsub.s32 1, %v680_v22  ;;  %v559_v52 = vld [vmem:[%s733_s2 + $0xc0] ss:$8 sps:$4 sm:$0xff]   ;;  %526 = vmatprep.mubr.msk.bf16.mxu0 %vm601_vm4, %v600_v53  ;;  %vm469_vm7 = vcmask 57344  }
  0x12   :  { %519 = vmatpush3.bf16.msra.mxu0 %v559_v52  ;;  %v560_v54 = vld [vmem:[%s733_s2 + $0xd0] ss:$8 sps:$4 sm:$0xff]   ;;  %v561_v55 = vld [vmem:[%s733_s2 + $0xe0] ss:$8 sps:$4 sm:$0xff]   ;;  %v440_v5 = vld [vmem:[%s734_s3 + $0x4] sm:$0x1] }
  0x13   :  { %v180_v28 = vrot.slane %v175_v24, %v179_v23  ;;  %v184_v31 = vrot.slane %v175_v24, %v183_v25  ;;  %520 = vmatprep.subr.bf16.mxu0 %v600_v53  ;;  %v562_v56 = vld [vmem:[%s733_s2 + $0xf0] ss:$8 sps:$4 sm:$0xff]   ;;  %v493_v57 = vld [vmem:[%s734_s3 + $0x2] ss:$0 sm:$0xff]  ;;  %443 = vperm.xlu0 %540, %v440_v5   ;;  %v504_v6 = vld [vmem:[%s734_s3 + $0x3] ss:$0 sm:$0xff] }
  0x14   :  { %274 = vmatpush1.bf16.msra.mxu1 %v553_v14  ;;  %v54_v19 = vld [vmem:[%s733_s2 + $0x100] sm:$0xf]  ;;  %s602_s2 = smov [#allocation2]  }
  0x15   :  { %275 = vmatprep.subr.bf16.mxu1 %v599_v2  ;;  %s477_s3 = sshll.u32 %s602_s2, 4  ;;  %s478_s3 = int_to_ptr.vmem [resolvable:$true] %s477_s3 }
  0x16   :  { %521 = vmatpush3.bf16.msra.mxu0 %v560_v54  ;;  %s575_s11 = scalar_lea.vmem %s478_s3, 16  ;;  %s579_s12 = scalar_lea.vmem %s478_s3, 32 }
  0x17   :  { %522 = vmatprep.subr.bf16.mxu0 %v600_v53  ;;  %p576_p0 = scmp.ne.s32.totalorder %s478_s3, %s575_s11  ;;  %p580_p1 = scmp.lt.s32.totalorder %s478_s3, %s478_s3 }
  0x18   :  { %276 = vmatpush1.bf16.msra.mxu1 %v554_v15  ;;  %p581_p2 = scmp.lt.s32.totalorder %s579_s12, %s575_s11 }
  0x19   :  { %277 = vmatprep.subr.bf16.mxu1 %v599_v2 }
  0x1a   :  { %523 = vmatpush3.bf16.msra.mxu0 %v561_v55  ;;  %p582_p3 = por %p581_p2, %p580_p1 }
  0x1b   :  { %524 = vmatprep.subr.bf16.mxu0 %v600_v53 }
  0x1c   :  { %278 = vmatpush1.bf16.msra.mxu1 %v555_v16  ;;  %p583_p4 = pnand %p582_p3, %p576_p0 }
  0x1d   :  { %279 = vmatprep.subr.bf16.mxu1 %v599_v2 }
  0x1e   :  { %525 = vmatpush3.bf16.msra.mxu0 %v562_v56 }
  0x1f   :  { %530 = vmatprep.subr.bf16.mxu0 %v600_v53 }
  0x20   :  { %280 = vmatpush1.bf16.msra.mxu1 %v556_v17 }
  0x21   :  { %281 = vmatprep.subr.bf16.mxu1 %v599_v2 }
  0x24   :  { %282 = vmatpush1.bf16.msra.mxu1 %v557_v18 }
  0x25   :  { %283 = vmatprep.subr.bf16.mxu1 %v599_v2 }
  0x28   :  { %284 = vmatpush1.bf16.msra.mxu1 %v265_v20 }
  0x92   :  { %v444_v20 = vpop.permute.xlu0 %443 }
  0x93   :  { %v449_v21 = vrot.slane %v444_v20, %v179_v23 }
  0xda   :  { %v168_v26 = vpop.f32.mrb[0].mxu1 }
  0xdb   :  { %v170_v27 = vpop.f32.mrb[1].mxu1 }
  0xdc   :  { %v172_v29 = vpop.f32.mrb[2].mxu1 }
  0xdd   :  { %v113_v30 = vpop.f32.mrb[0].mxu0  ;;  %v173_v33 = vpop.f32.mrb[3].mxu1 }
  0xde   :  { %v169_v32 = vadd.f32 %v168_v26, %v113_v30  ;;  %v115_v34 = vpop.f32.mrb[1].mxu0 }
  0xdf   :  { %v171_v35 = vadd.f32 %v170_v27, %v115_v34  ;;  %v117_v36 = vpop.f32.mrb[2].mxu0 }
  0xe0   :  { %v187_v37 = vadd.f32 %v180_v28, %v169_v32  ;;  %v118_v38 = vpop.f32.mrb[3].mxu0 }
  0xe1   :  { %v188_v39 = vadd.f32 %v184_v31, %v171_v35 }
  0xe2   :  { %v191_v40 = vmul.f32 0.70710677, %v187_v37  ;;  %v189_v44 = vmul.f32 0.5, %v187_v37 }
  0xe3   :  { %v192_v41 = vmul.f32 0.70710677, %v188_v39  ;;  %v190_v46 = vmul.f32 0.5, %v188_v39 }
  0xe4   :  { %563 = verf.f32 %v191_v40 }
  0xe5   :  { %565 = verf.f32 %v192_v41 }
  0xee   :  { %v564_v42 = vpop.eup %563 }
  0xef   :  { %v566_v43 = vpop.eup %565  ;;  %v195_v45 = vadd.f32 1.0, %v564_v42 }
  0xf0   :  { %v196_v47 = vadd.f32 1.0, %v566_v43 }
  0xf1   :  { %v197_v48 = vmul.f32 %v195_v45, %v189_v44 }
  0xf2   :  { %v198_v49 = vmul.f32 %v196_v47, %v190_v46 }
  0xf3   :  { %v199_v51 = vpack.c.bf16 %v197_v48, %v197_v48 }
  0xf4   :  { %v200_v50 = vpack.c.bf16 %v198_v49, %v198_v49 }
  0xf6   :  { %503 = vmatprep.mubr.msk.bf16.mxu1 %vm259_vm3, %v200_v50 }
  0xf7   :  { %300 = vmatmul.mubr.bf16.vlgmr.msra.gmra.mrb[4].mxu1 %v199_v51 }
 0x1ca   :  { %v301_v58 = vpop.f32.mrb[4].mxu1 }
 0x1cb   :  { %v302_v59 = vadd.f32 %v493_v57, %v301_v58  ;;  %v303_v60 = vpop.f32.mrb[5].mxu1 }
 0x1cc   :  { %v304_v61 = vpop.f32.mrb[6].mxu1 }
 0x1cd   :  { %v308_v62 = vmul.f32 0.70710677, %v302_v59  ;;  %v305_v63 = vpop.f32.mrb[7].mxu1  ;;  %v307_v1 = vmul.f32 0.5, %v302_v59 }
 0x1cf   :  { %567 = verf.f32 %v308_v62 }
 0x1d9   :  { %v568_v0 = vpop.eup %567 }
 0x1da   :  { %v310_v2 = vadd.f32 1.0, %v568_v0 }
 0x1dc   :  { %v311_v3 = vmul.f32 %v310_v2, %v307_v1 }
 0x1de   :  { %v312_v4 = vpack.c.bf16 %v311_v3, %v311_v3 }
 0x1e0   :  { %527 = vmatmul.mubr.msk.bf16.vlgmr.msra.gmra.mrb[4].mxu0 %vm344_vm5, %v312_v4 }
 0x1e1   :  { %532 = vmatprep.mubr.msk.bf16.mxu0 %vm601_vm4, %v600_v53 }
 0x2b3   :  { %v382_v7 = vpop.f32.mrb[4].mxu0 }
 0x2b4   :  { %v383_v8 = vadd.f32 %v504_v6, %v382_v7  ;;  %v528_v9 = vpop.f32.mrb[5].mxu0 }
 0x2b5   :  { %v385_v10 = vpop.f32.mrb[6].mxu0 }
 0x2b6   :  { %v389_v11 = vmul.f32 0.70710677, %v383_v8  ;;  %v529_v12 = vpop.f32.mrb[7].mxu0  ;;  %v388_v14 = vmul.f32 0.5, %v383_v8 }
 0x2b8   :  { %569 = verf.f32 %v389_v11 }
 0x2c2   :  { %v570_v13 = vpop.eup %569 }
 0x2c3   :  { %v391_v15 = vadd.f32 1.0, %v570_v13 }
 0x2c5   :  { %v392_v16 = vmul.f32 %v391_v15, %v388_v14 }
 0x2c7   :  { %v393_v17 = vpack.c.bf16 %v392_v16, %v392_v16 }
 0x2c9   :  { %v398_v18 = vsel %vm130_vm0, %v393_v17, 0 }
 0x2ca   :  { %531 = vmatpush3.bf16.xpose.msra.mxu0 %v398_v18 }
 0x2d1   :  { %533 = vmatmul.mubr.msk.bf16.vlgmr.msra.gmra.mrb[8].mxu0 %vm130_vm0, %v54_v19 }
 0x3a4   :  { %v434_v24 = vpop.f32.mrb[8].mxu0 }
 0x3a5   :  { %v450_v25 = vadd.f32 %v449_v21, %v434_v24  ;;  %v534_v26 = vpop.f32.mrb[9].mxu0 }
 0x3a6   :  { %v437_v27 = vpop.f32.mrb[10].mxu0 }
 0x3a7   :  { %v454_v28 = vand.u32 2147483647, %v450_v25  ;;  %v535_v29 = vpop.f32.mrb[11].mxu0  ;;  %v451_v22 = vmax.f32 %v450_v25, 0.0  ;;  %vm452_vm8 = vcmp.ne.f32.partialorder %v450_v25, %v450_v25 }
 0x3a9   :  { %v455_v30 = vsub.f32 0.0, %v454_v28 }
 0x3ab   :  { %v456_v31 = vmul.f32 1.442695, %v455_v30 }
 0x3ad   :  { %571 = vpow2.f32 %v456_v31 }
 0x3b7   :  { %v572_v32 = vpop.eup %571 }
 0x3b8   :  { %v458_v33 = vadd.f32 1.0, %v572_v32  ;;  %v461_v34 = vmul.f32 -0.5, %v572_v32  ;;  %v464_v36 = vand.u32 2147483647, %v572_v32 }
 0x3ba   :  { %573 = vlog2.f32 %v458_v33  ;;  %v462_v35 = vadd.f32 1.0, %v461_v34  ;;  %vm465_vm6 = vcmp.lt.f32.partialorder %v464_v36, 0.0004427343 }
 0x3bc   :  { %v463_v39 = vmul.f32 %v572_v32, %v462_v35 }
 0x3c4   :  { %v574_v37 = vpop.eup %573 }
 0x3c5   :  { %v460_v38 = vmul.f32 0.6931472, %v574_v37 }
 0x3c7   :  { %v466_v23 = vsel %vm465_vm6, %v463_v39, %v460_v38 }
 0x3c8   :  { %v467_v40 = vadd.f32 %v466_v23, %v451_v22 }
 0x3ca   :  { %v468_v41 = vsel %vm452_vm8, %v450_v25, %v467_v40 }
 0x3cb   :  { %470 = vst.msk [vmem:[#allocation2] sm:$0x1] %vm469_vm7, %v468_v41 }
 0x3cc   :  { %586 = shalt.err (!%p583_p4)
}
 0x3cd   :  { %s587_s15 = scalar_lea.hbm %s735_s4, 16 }
 0x3ce   :  { %p588_p5 = scmp.ne.s32.totalorder %s735_s4, %s587_s15  ;;  %p591_p6 = scmp.lt.u32.totalorder %s587_s15, %s735_s4 }
 0x3d0   :  { %p593_p7 = pnand %p591_p6, %p588_p5 }
 0x3d2   :  { %596 = shalt.err (!%p593_p7)
}
 0x3d3   :  { %480 = dma.vmem_to_hbm [thread:$0]  %s478_s3, 16, %s735_s4, [#allocation3]  }
 0x3d4   :  { %597 = dma.done.wait [#allocation3], 16  }
 0x3d5   :  { %598 = vsyncadd [#allocation3], 4294967280 }
 0x3d6   :  { %484 = vsyncpa [#allocation3], 1 }

</bundles_post_ra>
